<compile_context>
chip_gen: v6e
topology: v6e:2x2x1
jax: 0.10.0
libtpu: 0.0.40
codegen_flags: <defaults>
</compile_context>

<pallas_src>
import jax
import jax.numpy as jnp
from jax.experimental import pallas as pl
from jax.experimental.pallas import tpu as pltpu

# Lanes per grid step (sweepable). (3, 65536) f32 pads to 8 sublanes -> 2 MiB
# per block; in + out, double-buffered = ~8 MiB VMEM.
_TILE_N = 65536


def _reflect_kernel(loc_ref, nrm_ref, two_n_ref, pts_ref, out_ref):
    """Reflect lane-dense xyz rows across the plane (loc, n).

    loc_ref / nrm_ref / two_n_ref : VMEM (3, 1) f32  (plane point, unit normal, 2*normal)
    pts_ref / out_ref             : VMEM (3, T) f32  (rows = xyz, lanes = points)
    """
    pts = pts_ref[...]                                       # (3, T) block load
    t = pts - loc_ref[...]                                   # lane-broadcast subtract
    d = jnp.sum(t * nrm_ref[...], axis=0, keepdims=True)     # (1, T) sublane reduce (XLU)
    # reflected = (pts - loc) - 2*d*n + loc == pts - 2*d*n
    out_ref[...] = pts - two_n_ref[...] * d


def reflect_lane_major(pts_t, loc, nrm, two_n, *, tile_n=_TILE_N):
    """Reflect a lane-dense (3, N) float32 cloud across the plane (loc, nrm)."""
    three, n = pts_t.shape
    assert three == 3, pts_t.shape

    if n <= tile_n:
        tile = n                       # single block == full array (any width ok)
    else:
        tile = max(128, (tile_n // 128) * 128)   # lane-aligned when tiling
    grid = (pl.cdiv(n, tile),)         # ragged last block handled by Pallas

    vec_spec = pl.BlockSpec((3, 1), lambda i: (0, 0))   # resident tiny constants
    return pl.pallas_call(
        _reflect_kernel,
        out_shape=jax.ShapeDtypeStruct((3, n), jnp.float32),
        grid=grid,
        in_specs=[
            vec_spec,                                   # loc
            vec_spec,                                   # unit normal
            vec_spec,                                   # 2 * unit normal
            pl.BlockSpec((3, tile), lambda i: (0, i)),  # points tile (lane-dense)
        ],
        out_specs=pl.BlockSpec((3, tile), lambda i: (0, i)),
        compiler_params=pltpu.CompilerParams(
            dimension_semantics=("parallel",),
        ),
    )(loc, nrm, two_n, pts_t)


def _plane_params(sixdof):
    """Hoisted normalization: loc, unit normal, 2*unit normal as (3,1) arrays."""
    s = sixdof.astype(jnp.float32)
    loc = s[:3].reshape(3, 1)
    ori = s[3:].reshape(3, 1)
    nrm = ori * jax.lax.rsqrt(jnp.sum(ori * ori))
    return loc, nrm, 2.0 * nrm


@jax.jit
def _reflect_impl(points, sixdof):
    loc, nrm, two_n = _plane_params(sixdof)
    pts_t = points.astype(jnp.float32).T                 # (3, N) lane-dense
    return reflect_lane_major(pts_t, loc, nrm, two_n).T  # back to (N, 3)


@jax.jit
def _forward_impl(direct, points, sixdof):
    loc, nrm, two_n = _plane_params(sixdof)
    pts_t = points.astype(jnp.float32).T
    reflected_t = reflect_lane_major(pts_t, loc, nrm, two_n)
    return jnp.concatenate(
        [direct.astype(jnp.float32), reflected_t.T], axis=0
    )


class Reconstructor:
    """JAX/Pallas port of the PyTorch Reconstructor forward pass."""

    def __init__(self, key):
        # nn.Parameter(torch.randn(6)) -> deterministic random init here
        self.sixdof = jax.random.normal(key, (6,), dtype=jnp.float32)
        self.direct = None
        self.dist_weight = 0.1

    def set_direct(self, direct):
        self.direct = jnp.asarray(direct, dtype=jnp.float32)

    def set_normal(self, normal):
        self.sixdof = jnp.asarray(normal, dtype=jnp.float32)

    def reflect(self, points):
        return _reflect_impl(jnp.asarray(points, jnp.float32), self.sixdof)

    def forward(self, points):
        assert self.direct is not None
        return _forward_impl(
            self.direct, jnp.asarray(points, jnp.float32), self.sixdof
        )

    # TODO(synk): loss()/knn()/gaussian_curvature()/chamfer_distance()/
    # initialize_by_mirror() rely on BallTree / eigh / SVD with host-side,
    # data-dependent control flow; they are not part of forward() and are not
    # translated to Pallas.


def _reflect_ref(points, sixdof):
    """Pure-JAX reference for correctness checking."""
    loc = sixdof[:3]
    ori = sixdof[3:]
    ori = (ori / jnp.linalg.norm(ori)).reshape(1, 3)
    t = points.astype(jnp.float32) - loc
    proj = jnp.sum(t * ori, axis=1, keepdims=True) * ori
    return (t - 2.0 * proj + loc).astype(jnp.float32)


if __name__ == "__main__":
    key = jax.random.PRNGKey(0)
    k_param, k_direct, k_pts, k_big = jax.random.split(key, 4)

    model = Reconstructor(k_param)

    # small synthetic clouds: direct (M=8, 3), points to reflect (N=8, 3)
    direct = jax.random.normal(k_direct, (8, 3), dtype=jnp.float32)
    points = jax.random.normal(k_pts, (8, 3), dtype=jnp.float32)

    model.set_direct(direct)

    cloud = jax.block_until_ready(model.forward(points))
    expected = jnp.concatenate([direct, _reflect_ref(points, model.sixdof)], axis=0)
    assert cloud.shape == (16, 3), cloud.shape
    assert cloud.dtype == jnp.float32, cloud.dtype
    assert jnp.allclose(cloud, expected, atol=1e-5, rtol=1e-5)

    # larger, ragged N through the jitted reflect path (single block)
    big_pts = jax.random.normal(k_big, (1000, 3), dtype=jnp.float32)
    big_ref = _reflect_ref(big_pts, model.sixdof)
    big_out = jax.block_until_ready(model.reflect(big_pts))
    assert big_out.shape == (1000, 3), big_out.shape
    assert jnp.allclose(big_out, big_ref, atol=1e-5, rtol=1e-5)

    # exercise the multi-block / ragged-boundary grid path with a small tile
    loc, nrm, two_n = _plane_params(model.sixdof)
    tiled_out = jax.block_until_ready(
        reflect_lane_major(big_pts.T, loc, nrm, two_n, tile_n=256).T
    )
    assert tiled_out.shape == (1000, 3), tiled_out.shape
    assert jnp.allclose(tiled_out, big_ref, atol=1e-5, rtol=1e-5)

    print("KERNEL_OK")
</pallas_src>

<mosaic_0001>
module attributes {stable_mosaic.version = 11 : i64} {
  func.func @_reflect_kernel(%arg0: i32, %arg1: memref<3x1xf32, #tpu.memory_space<vmem>>, %arg2: memref<3x1xf32, #tpu.memory_space<vmem>>, %arg3: memref<3x1xf32, #tpu.memory_space<vmem>>, %arg4: memref<3x8xf32, #tpu.memory_space<vmem>>, %arg5: memref<3x8xf32, #tpu.memory_space<vmem>>) attributes {dimension_semantics = [#tpu.dimension_semantics<parallel>], iteration_bounds = array<i64: 1>, scalar_prefetch = 0 : i64, scratch_operands = 0 : i64, tpu.core_type = #tpu.core_type<tc>, window_params = [{pipeline_mode = #tpu.pipeline_mode<synchronous>, transform_indices = @transform_0, window_bounds = array<i64: 3, 1>}, {pipeline_mode = #tpu.pipeline_mode<synchronous>, transform_indices = @transform_1, window_bounds = array<i64: 3, 1>}, {pipeline_mode = #tpu.pipeline_mode<synchronous>, transform_indices = @transform_2, window_bounds = array<i64: 3, 1>}, {transform_indices = @transform_3, window_bounds = array<i64: 3, 8>}, {transform_indices = @transform_4, window_bounds = array<i64: 3, 8>}]} {
    %c0 = arith.constant 0 : index
    %c0_0 = arith.constant 0 : index
    %0 = vector.load %arg4[%c0, %c0_0] : memref<3x8xf32, #tpu.memory_space<vmem>>, vector<3x8xf32>
    %c0_1 = arith.constant 0 : index
    %c0_2 = arith.constant 0 : index
    %1 = vector.load %arg1[%c0_1, %c0_2] : memref<3x1xf32, #tpu.memory_space<vmem>>, vector<3x1xf32>
    %2 = vector.broadcast %1 : vector<3x1xf32> to vector<3x8xf32>
    %3 = arith.subf %0, %2 : vector<3x8xf32>
    %c0_3 = arith.constant 0 : index
    %c0_4 = arith.constant 0 : index
    %4 = vector.load %arg2[%c0_3, %c0_4] : memref<3x1xf32, #tpu.memory_space<vmem>>, vector<3x1xf32>
    %5 = vector.broadcast %4 : vector<3x1xf32> to vector<3x8xf32>
    %6 = arith.mulf %3, %5 : vector<3x8xf32>
    %cst = arith.constant dense<0.000000e+00> : vector<8xf32>
    %7 = vector.multi_reduction <add>, %6, %cst [0] : vector<3x8xf32> to vector<8xf32>
    %8 = vector.shape_cast %7 : vector<8xf32> to vector<1x8xf32>
    %c0_5 = arith.constant 0 : index
    %c0_6 = arith.constant 0 : index
    %9 = vector.load %arg3[%c0_5, %c0_6] : memref<3x1xf32, #tpu.memory_space<vmem>>, vector<3x1xf32>
    %10 = vector.broadcast %9 : vector<3x1xf32> to vector<3x8xf32>
    %11 = vector.broadcast %8 : vector<1x8xf32> to vector<3x8xf32>
    %12 = arith.mulf %10, %11 : vector<3x8xf32>
    %13 = arith.subf %0, %12 : vector<3x8xf32>
    %c0_7 = arith.constant 0 : index
    %c0_8 = arith.constant 0 : index
    %14 = vector.load %arg5[%c0_7, %c0_8] : memref<3x8xf32, #tpu.memory_space<vmem>>, vector<3x8xf32>
    tpu.vector_store %arg5[%c0_7, %c0_8], %13 {strides = array<i32>} : memref<3x8xf32, #tpu.memory_space<vmem>>, vector<3x8xf32>,
    return
  }
  func.func @transform_0(%arg0: i32) -> (i32, i32) {
    %c0_i32 = arith.constant 0 : i32
    %c0_i32_0 = arith.constant 0 : i32
    %c0_i32_1 = arith.constant 0 : i32
    return %c0_i32, %c0_i32_0 : i32, i32
  }
  func.func @transform_1(%arg0: i32) -> (i32, i32) {
    %c0_i32 = arith.constant 0 : i32
    %c0_i32_0 = arith.constant 0 : i32
    %c0_i32_1 = arith.constant 0 : i32
    return %c0_i32, %c0_i32_0 : i32, i32
  }
  func.func @transform_2(%arg0: i32) -> (i32, i32) {
    %c0_i32 = arith.constant 0 : i32
    %c0_i32_0 = arith.constant 0 : i32
    %c0_i32_1 = arith.constant 0 : i32
    return %c0_i32, %c0_i32_0 : i32, i32
  }
  func.func @transform_3(%arg0: i32) -> (i32, i32) {
    %c0_i32 = arith.constant 0 : i32
    %c0_i32_0 = arith.constant 0 : i32
    return %c0_i32, %arg0 : i32, i32
  }
  func.func @transform_4(%arg0: i32) -> (i32, i32) {
    %c0_i32 = arith.constant 0 : i32
    %c0_i32_0 = arith.constant 0 : i32
    return %c0_i32, %arg0 : i32, i32
  }
}

</mosaic_0001>

<bundles_post_ra>
// kernel: _forward_impl.1
= control target key start
LH: loop header
LB: loop body
LE: loop exit
PB: predicated region body
PF: predicated region fallthrough
CT: control target
= control target key end

     0   :  { %v56_v0 = vmov 0   ;;  %vm32_vm0 = vcmask 59392   ;;  %s97_s0 = inlined_call_operand.vmem [shape: f32[3,1], index: 0, kind: input, shape index: {}]   ;;  %s98_s1 = inlined_call_operand.vmem [shape: f32[3,1], index: 1, kind: input, shape index: {}]   ;;  %s99_s2 = inlined_call_operand.vmem [shape: f32[3,1], index: 2, kind: input, shape index: {}]   ;;  %s100_s3 = inlined_call_operand.vmem [shape: f32[3,8], index: 3, kind: input, shape index: {}]   ;;  %s101_s4 = inlined_call_operand.vmem [shape: f32[3,8], index: 4, kind: output, shape index: {}]  }
   0x1   :  { %54 = vset.pattern.permute.xlu0 %v56_v0  ;;  %v18_v1 = vld [vmem:[%s97_s0] sm:$0x7]  ;;  %55 = vset.pattern.permute.xlu1 %v56_v0 }
   0x2   :  { %v40_v2 = vld [vmem:[%s99_s2] sm:$0x7]  ;;  %21 = vperm.xlu0 %54, %v18_v1  }
   0x3   :  { %43 = vperm.xlu1 %55, %v40_v2   ;;  %v25_v3 = vld [vmem:[%s98_s1] sm:$0x7] }
   0x4   :  { %v17_v4 = vld [vmem:[%s100_s3] sm:$0x7] }
   0x6   :  { %28 = vperm.xlu0 %54, %v25_v3  }
  0x7d   :  { %v22_v5 = vpop.permute.xlu0 %21 }
  0x7e   :  { %v24_v6 = vsub.f32 %v17_v4, %v22_v5  ;;  %v44_v15 = vpop.permute.xlu1 %43 }
  0x81   :  { %v29_v7 = vpop.permute.xlu0 %28 }
  0x82   :  { %v31_v8 = vmul.f32 %v29_v7, %v24_v6 }
  0x84   :  { %v33_v9 = vsel %vm32_vm0, %v31_v8, 0.0 }
  0x85   :  { %v34_v10 = vrot.slane %v33_v9, 4 }
  0x87   :  { %v35_v11 = vadd.f32 %v34_v10, %v33_v9 }
  0x89   :  { %v36_v12 = vrot.slane %v35_v11, 2 }
  0x8b   :  { %v37_v13 = vadd.f32 %v36_v12, %v35_v11 }
  0x8d   :  { %v38_v14 = vrot.slane %v37_v13, 1 }
  0x8f   :  { %v39_v16 = vadd.f32 %v38_v14, %v37_v13 }
  0x91   :  { %v46_v17 = vmul.f32 %v44_v15, %v39_v16 }
  0x93   :  { %v47_v18 = vsub.f32 %v17_v4, %v46_v17 }
  0x95   :  { %48 = vst.msk [vmem:[%s101_s4] sm:$0x7] %vm32_vm0, %v47_v18 }

</bundles_post_ra>
